<compile_context>
chip_gen: v6e
topology: v6e:2x2x1
jax: 0.10.0
libtpu: 0.0.40
codegen_flags: <defaults>
</compile_context>

<pallas_src>
import functools

import jax
import jax.numpy as jnp
from jax.experimental import pallas as pl
from jax.experimental.pallas import tpu as pltpu

HID = 8          # hidden widths 7/7/6 padded to 8 sublanes (VMEM-only)
SMALL_B = 512    # below this: single tile, grid=1, no batch padding
TB_MAX = 8192    # max batch-tile width (lane axis); ~1.5 MiB double-buffered


def _round_up(n, m):
    return ((n + m - 1) // m) * m


def _net_kernel(xt_ref, w1_ref, b1_ref, w2_ref, b2_ref, w3_ref, b3_ref,
                w4_ref, b4_ref, o_ref):
    """4-layer MLP forward on one feature-major (features, tb) batch tile.

    xt_ref : (input_dim, tb)   -- batch along the 128-wide lane axis
    wN_ref : (out_pad8, in_pad) PyTorch-convention (out, in) weights, padded
    bN_ref : (out_pad8, 1)
    o_ref  : (out_pad8, tb)
    """
    xt = xt_ref[...]

    h = jnp.maximum(
        jnp.dot(w1_ref[...], xt, preferred_element_type=jnp.float32)
        + b1_ref[...], 0.0)                                         # (8, tb)
    h = jnp.maximum(
        jnp.dot(w2_ref[...], h, preferred_element_type=jnp.float32)
        + b2_ref[...], 0.0)                                         # (8, tb)
    h = jnp.maximum(
        jnp.dot(w3_ref[...], h, preferred_element_type=jnp.float32)
        + b3_ref[...], 0.0)                                         # (8, tb)
    out = (jnp.dot(w4_ref[...], h, preferred_element_type=jnp.float32)
           + b4_ref[...])                                           # (out_pad, tb)
    o_ref[...] = out.astype(o_ref.dtype)


def prepare_params(params, input_dim, action_size):
    """Pad weights/biases ONCE (hoisted out of the per-step jit path).

    Weights are taken in PyTorch nn.Linear convention: wN is (out, in),
    bN is (out,).  Output features are padded to 8 sublanes; zero padding
    plus ReLU(0)=0 keeps the forward pass exact.
    """
    out_pad = _round_up(max(action_size, 1), HID)

    def pad_w(w, rows, cols):
        return jnp.pad(w, ((0, rows - w.shape[0]), (0, cols - w.shape[1])))

    def pad_b(b, rows):
        return jnp.pad(b, (0, rows - b.shape[0]))[:, None]

    return {
        "w1": pad_w(params["w1"], HID, input_dim),   # (8, input_dim)
        "b1": pad_b(params["b1"], HID),              # (8, 1)
        "w2": pad_w(params["w2"], HID, HID),         # (8, 8)
        "b2": pad_b(params["b2"], HID),
        "w3": pad_w(params["w3"], HID, HID),         # (8, 8)
        "b3": pad_b(params["b3"], HID),
        "w4": pad_w(params["w4"], out_pad, HID),     # (out_pad8, 8)
        "b4": pad_b(params["b4"], out_pad),          # (out_pad8, 1)
    }


@functools.partial(jax.jit, static_argnames=("action_size",))
def net_forward(x, padded_params, action_size):
    """x: (B, input_dim) float32.  Returns (B, action_size) float32."""
    B, input_dim = x.shape
    pp = padded_params
    out_pad = pp["w4"].shape[0]

    # Feature-major: batch goes onto the 128-wide lane axis.
    xt = x.T                                            # (input_dim, B)

    if B <= SMALL_B:
        # Single full-array tile: no batch padding, blocks equal full dims.
        tb, bp = B, B
    else:
        # Lane-dense tiles (multiple of 128) and >= 2 grid steps so the
        # "parallel" batch axis can shard across v7x's two TensorCores.
        tb = min(TB_MAX, _round_up(pl.cdiv(B, 2), 128))
        bp = _round_up(B, tb)
        if bp != B:
            xt = jnp.pad(xt, ((0, 0), (0, bp - B)))      # every tile full/in-bounds

    grid = (bp // tb,)

    def const_spec(a):
        # Full-array block, same block index every step -> weights/biases stay
        # resident in VMEM instead of being re-DMA'd per batch tile.
        return pl.BlockSpec(a.shape, lambda i: (0, 0))

    x_spec = pl.BlockSpec((input_dim, tb), lambda i: (0, i))
    o_spec = pl.BlockSpec((out_pad, tb), lambda i: (0, i))

    out_t = pl.pallas_call(
        _net_kernel,
        out_shape=jax.ShapeDtypeStruct((out_pad, bp), jnp.float32),
        grid_spec=pltpu.PrefetchScalarGridSpec(
            num_scalar_prefetch=0,
            grid=grid,
            in_specs=[
                x_spec,
                const_spec(pp["w1"]), const_spec(pp["b1"]),
                const_spec(pp["w2"]), const_spec(pp["b2"]),
                const_spec(pp["w3"]), const_spec(pp["b3"]),
                const_spec(pp["w4"]), const_spec(pp["b4"]),
            ],
            out_specs=o_spec,
        ),
        compiler_params=pltpu.CompilerParams(
            dimension_semantics=("parallel",)),
    )(xt, pp["w1"], pp["b1"], pp["w2"], pp["b2"],
      pp["w3"], pp["b3"], pp["w4"], pp["b4"])

    # Back to the PyTorch-facing (B, action_size) layout (tiny array).
    return out_t[:action_size, :B].T


def init_params(key, input_dim, action_size):
    """nn.Linear-style init, PyTorch (out, in) weight convention."""
    dims = [(input_dim, 7), (7, 7), (7, 6), (6, action_size)]
    params = {}
    for i, (fan_in, fan_out) in enumerate(dims, start=1):
        key, kw, kb = jax.random.split(key, 3)
        bound = 1.0 / jnp.sqrt(jnp.float32(fan_in))
        params[f"w{i}"] = jax.random.uniform(
            kw, (fan_out, fan_in), jnp.float32, minval=-bound, maxval=bound)
        params[f"b{i}"] = jax.random.uniform(
            kb, (fan_out,), jnp.float32, minval=-bound, maxval=bound)
    return params


def reference_forward(x, params):
    h = jax.nn.relu(x @ params["w1"].T + params["b1"])
    h = jax.nn.relu(h @ params["w2"].T + params["b2"])
    h = jax.nn.relu(h @ params["w3"].T + params["b3"])
    return h @ params["w4"].T + params["b4"]


if __name__ == "__main__":
    input_dim = 16
    action_size = 4

    key = jax.random.PRNGKey(0)
    key, kx1, kx2, kx3 = jax.random.split(key, 4)
    params = init_params(key, input_dim, action_size)
    padded = prepare_params(params, input_dim, action_size)  # one-time padding

    # Case 1: small aligned batch (single-tile path).
    x1 = jax.random.normal(kx1, (8, input_dim), jnp.float32)
    y1 = jax.block_until_ready(net_forward(x1, padded, action_size))
    ref1 = reference_forward(x1, params)
    assert y1.shape == (8, action_size)
    assert jnp.allclose(y1, ref1, atol=1e-5, rtol=1e-5), \
        "Pallas kernel output does not match reference (small batch)"

    # Case 2: small ragged batch (single tile, block == full dims, no padding).
    x2 = jax.random.normal(kx2, (37, input_dim), jnp.float32)
    y2 = jax.block_until_ready(net_forward(x2, padded, action_size))
    ref2 = reference_forward(x2, params)
    assert y2.shape == (37, action_size)
    assert jnp.allclose(y2, ref2, atol=1e-5, rtol=1e-5), \
        "Pallas kernel output does not match reference (ragged batch)"

    # Case 3: large ragged batch (multi-tile path, lane-dense tiles, 2 steps).
    x3 = jax.random.normal(kx3, (1000, input_dim), jnp.float32)
    y3 = jax.block_until_ready(net_forward(x3, padded, action_size))
    ref3 = reference_forward(x3, params)
    assert y3.shape == (1000, action_size)
    assert jnp.allclose(y3, ref3, atol=1e-5, rtol=1e-5), \
        "Pallas kernel output does not match reference (large batch)"

    print("KERNEL_OK")
</pallas_src>

<mosaic_0001>
module attributes {stable_mosaic.version = 11 : i64} {
  func.func @_net_kernel(%arg0: i32, %arg1: memref<16x8xf32, #tpu.memory_space<vmem>>, %arg2: memref<8x16xf32, #tpu.memory_space<vmem>>, %arg3: memref<8x1xf32, #tpu.memory_space<vmem>>, %arg4: memref<8x8xf32, #tpu.memory_space<vmem>>, %arg5: memref<8x1xf32, #tpu.memory_space<vmem>>, %arg6: memref<8x8xf32, #tpu.memory_space<vmem>>, %arg7: memref<8x1xf32, #tpu.memory_space<vmem>>, %arg8: memref<8x8xf32, #tpu.memory_space<vmem>>, %arg9: memref<8x1xf32, #tpu.memory_space<vmem>>, %arg10: memref<8x8xf32, #tpu.memory_space<vmem>>) attributes {dimension_semantics = [#tpu.dimension_semantics<parallel>], iteration_bounds = array<i64: 1>, scalar_prefetch = 0 : i64, scratch_operands = 0 : i64, tpu.core_type = #tpu.core_type<tc>, window_params = [{transform_indices = @transform_0, window_bounds = array<i64: 16, 8>}, {pipeline_mode = #tpu.pipeline_mode<synchronous>, transform_indices = @transform_1, window_bounds = array<i64: 8, 16>}, {pipeline_mode = #tpu.pipeline_mode<synchronous>, transform_indices = @transform_2, window_bounds = array<i64: 8, 1>}, {pipeline_mode = #tpu.pipeline_mode<synchronous>, transform_indices = @transform_3, window_bounds = array<i64: 8, 8>}, {pipeline_mode = #tpu.pipeline_mode<synchronous>, transform_indices = @transform_4, window_bounds = array<i64: 8, 1>}, {pipeline_mode = #tpu.pipeline_mode<synchronous>, transform_indices = @transform_5, window_bounds = array<i64: 8, 8>}, {pipeline_mode = #tpu.pipeline_mode<synchronous>, transform_indices = @transform_6, window_bounds = array<i64: 8, 1>}, {pipeline_mode = #tpu.pipeline_mode<synchronous>, transform_indices = @transform_7, window_bounds = array<i64: 8, 8>}, {pipeline_mode = #tpu.pipeline_mode<synchronous>, transform_indices = @transform_8, window_bounds = array<i64: 8, 1>}, {transform_indices = @transform_9, window_bounds = array<i64: 8, 8>}]} {
    %c0 = arith.constant 0 : index
    %c0_0 = arith.constant 0 : index
    %0 = vector.load %arg1[%c0, %c0_0] : memref<16x8xf32, #tpu.memory_space<vmem>>, vector<16x8xf32>
    %c0_1 = arith.constant 0 : index
    %c0_2 = arith.constant 0 : index
    %1 = vector.load %arg2[%c0_1, %c0_2] : memref<8x16xf32, #tpu.memory_space<vmem>>, vector<8x16xf32>
    %cst = arith.constant dense<0.000000e+00> : vector<8x8xf32>
    %2 = tpu.matmul %1, %0, %cst {dimension_numbers = #tpu.dot_dimension_numbers<[1], [0], [0], [1], [0, 0, 1, 1], [], []>} : vector<8x16xf32>, vector<16x8xf32>, vector<8x8xf32> -> vector<8x8xf32>
    %c0_3 = arith.constant 0 : index
    %c0_4 = arith.constant 0 : index
    %3 = vector.load %arg3[%c0_3, %c0_4] : memref<8x1xf32, #tpu.memory_space<vmem>>, vector<8x1xf32>
    %4 = vector.broadcast %3 : vector<8x1xf32> to vector<8x8xf32>
    %5 = arith.addf %2, %4 : vector<8x8xf32>
    %cst_5 = arith.constant 0.000000e+00 : f32
    %6 = vector.broadcast %cst_5 : f32 to vector<8x8xf32>
    %7 = arith.maximumf %5, %6 : vector<8x8xf32>
    %c0_6 = arith.constant 0 : index
    %c0_7 = arith.constant 0 : index
    %8 = vector.load %arg4[%c0_6, %c0_7] : memref<8x8xf32, #tpu.memory_space<vmem>>, vector<8x8xf32>
    %cst_8 = arith.constant dense<0.000000e+00> : vector<8x8xf32>
    %9 = tpu.matmul %8, %7, %cst_8 {dimension_numbers = #tpu.dot_dimension_numbers<[1], [0], [0], [1], [0, 0, 1, 1], [], []>} : vector<8x8xf32>, vector<8x8xf32>, vector<8x8xf32> -> vector<8x8xf32>
    %c0_9 = arith.constant 0 : index
    %c0_10 = arith.constant 0 : index
    %10 = vector.load %arg5[%c0_9, %c0_10] : memref<8x1xf32, #tpu.memory_space<vmem>>, vector<8x1xf32>
    %11 = vector.broadcast %10 : vector<8x1xf32> to vector<8x8xf32>
    %12 = arith.addf %9, %11 : vector<8x8xf32>
    %cst_11 = arith.constant 0.000000e+00 : f32
    %13 = vector.broadcast %cst_11 : f32 to vector<8x8xf32>
    %14 = arith.maximumf %12, %13 : vector<8x8xf32>
    %c0_12 = arith.constant 0 : index
    %c0_13 = arith.constant 0 : index
    %15 = vector.load %arg6[%c0_12, %c0_13] : memref<8x8xf32, #tpu.memory_space<vmem>>, vector<8x8xf32>
    %cst_14 = arith.constant dense<0.000000e+00> : vector<8x8xf32>
    %16 = tpu.matmul %15, %14, %cst_14 {dimension_numbers = #tpu.dot_dimension_numbers<[1], [0], [0], [1], [0, 0, 1, 1], [], []>} : vector<8x8xf32>, vector<8x8xf32>, vector<8x8xf32> -> vector<8x8xf32>
    %c0_15 = arith.constant 0 : index
    %c0_16 = arith.constant 0 : index
    %17 = vector.load %arg7[%c0_15, %c0_16] : memref<8x1xf32, #tpu.memory_space<vmem>>, vector<8x1xf32>
    %18 = vector.broadcast %17 : vector<8x1xf32> to vector<8x8xf32>
    %19 = arith.addf %16, %18 : vector<8x8xf32>
    %cst_17 = arith.constant 0.000000e+00 : f32
    %20 = vector.broadcast %cst_17 : f32 to vector<8x8xf32>
    %21 = arith.maximumf %19, %20 : vector<8x8xf32>
    %c0_18 = arith.constant 0 : index
    %c0_19 = arith.constant 0 : index
    %22 = vector.load %arg8[%c0_18, %c0_19] : memref<8x8xf32, #tpu.memory_space<vmem>>, vector<8x8xf32>
    %cst_20 = arith.constant dense<0.000000e+00> : vector<8x8xf32>
    %23 = tpu.matmul %22, %21, %cst_20 {dimension_numbers = #tpu.dot_dimension_numbers<[1], [0], [0], [1], [0, 0, 1, 1], [], []>} : vector<8x8xf32>, vector<8x8xf32>, vector<8x8xf32> -> vector<8x8xf32>
    %c0_21 = arith.constant 0 : index
    %c0_22 = arith.constant 0 : index
    %24 = vector.load %arg9[%c0_21, %c0_22] : memref<8x1xf32, #tpu.memory_space<vmem>>, vector<8x1xf32>
    %25 = vector.broadcast %24 : vector<8x1xf32> to vector<8x8xf32>
    %26 = arith.addf %23, %25 : vector<8x8xf32>
    %c0_23 = arith.constant 0 : index
    %c0_24 = arith.constant 0 : index
    %27 = vector.load %arg10[%c0_23, %c0_24] : memref<8x8xf32, #tpu.memory_space<vmem>>, vector<8x8xf32>
    tpu.vector_store %arg10[%c0_23, %c0_24], %26 {strides = array<i32>} : memref<8x8xf32, #tpu.memory_space<vmem>>, vector<8x8xf32>,
    return
  }
  func.func @transform_0(%arg0: i32) -> (i32, i32) {
    %c0_i32 = arith.constant 0 : i32
    %c0_i32_0 = arith.constant 0 : i32
    return %c0_i32, %arg0 : i32, i32
  }
  func.func @transform_1(%arg0: i32) -> (i32, i32) {
    %c0_i32 = arith.constant 0 : i32
    %c0_i32_0 = arith.constant 0 : i32
    %c0_i32_1 = arith.constant 0 : i32
    return %c0_i32, %c0_i32_0 : i32, i32
  }
  func.func @transform_2(%arg0: i32) -> (i32, i32) {
    %c0_i32 = arith.constant 0 : i32
    %c0_i32_0 = arith.constant 0 : i32
    %c0_i32_1 = arith.constant 0 : i32
    return %c0_i32, %c0_i32_0 : i32, i32
  }
  func.func @transform_3(%arg0: i32) -> (i32, i32) {
    %c0_i32 = arith.constant 0 : i32
    %c0_i32_0 = arith.constant 0 : i32
    %c0_i32_1 = arith.constant 0 : i32
    return %c0_i32, %c0_i32_0 : i32, i32
  }
  func.func @transform_4(%arg0: i32) -> (i32, i32) {
    %c0_i32 = arith.constant 0 : i32
    %c0_i32_0 = arith.constant 0 : i32
    %c0_i32_1 = arith.constant 0 : i32
    return %c0_i32, %c0_i32_0 : i32, i32
  }
  func.func @transform_5(%arg0: i32) -> (i32, i32) {
    %c0_i32 = arith.constant 0 : i32
    %c0_i32_0 = arith.constant 0 : i32
    %c0_i32_1 = arith.constant 0 : i32
    return %c0_i32, %c0_i32_0 : i32, i32
  }
  func.func @transform_6(%arg0: i32) -> (i32, i32) {
    %c0_i32 = arith.constant 0 : i32
    %c0_i32_0 = arith.constant 0 : i32
    %c0_i32_1 = arith.constant 0 : i32
    return %c0_i32, %c0_i32_0 : i32, i32
  }
  func.func @transform_7(%arg0: i32) -> (i32, i32) {
    %c0_i32 = arith.constant 0 : i32
    %c0_i32_0 = arith.constant 0 : i32
    %c0_i32_1 = arith.constant 0 : i32
    return %c0_i32, %c0_i32_0 : i32, i32
  }
  func.func @transform_8(%arg0: i32) -> (i32, i32) {
    %c0_i32 = arith.constant 0 : i32
    %c0_i32_0 = arith.constant 0 : i32
    %c0_i32_1 = arith.constant 0 : i32
    return %c0_i32, %c0_i32_0 : i32, i32
  }
  func.func @transform_9(%arg0: i32) -> (i32, i32) {
    %c0_i32 = arith.constant 0 : i32
    %c0_i32_0 = arith.constant 0 : i32
    return %c0_i32, %arg0 : i32, i32
  }
}

</mosaic_0001>

<bundles_post_ra>
// kernel: net_forward.1
= control target key start
LH: loop header
LB: loop body
LE: loop exit
PB: predicated region body
PF: predicated region fallthrough
CT: control target
= control target key end

     0   :  { %v404_v0 = vmov 0.0   ;;  %vm405_vm0 = vmmov 0   ;;  %vm41_vm1 = vcmask 130048   ;;  %v406_v4 = vmov 0   ;;  %s498_s0 = inlined_call_operand.vmem [shape: f32[16,8], index: 0, kind: input, shape index: {}]   ;;  %s499_s1 = inlined_call_operand.vmem [shape: f32[8,16], index: 1, kind: input, shape index: {}]   ;;  %s500_s2 = inlined_call_operand.vmem [shape: f32[8,1], index: 2, kind: input, shape index: {}]   ;;  %s501_s4 = inlined_call_operand.vmem [shape: f32[8,1], index: 4, kind: input, shape index: {}]   ;;  %s502_s3 = inlined_call_operand.vmem [shape: f32[8,8], index: 3, kind: input, shape index: {}]   ;;  %s503_s6 = inlined_call_operand.vmem [shape: f32[8,1], index: 6, kind: input, shape index: {}]   ;;  %s504_s8 = inlined_call_operand.vmem [shape: f32[8,1], index: 8, kind: input, shape index: {}]   ;;  %s505_s5 = inlined_call_operand.vmem [shape: f32[8,8], index: 5, kind: input, shape index: {}]   ;;  %s506_s7 = inlined_call_operand.vmem [shape: f32[8,8], index: 7, kind: input, shape index: {}]   ;;  %s507_s9 = inlined_call_operand.vmem [shape: f32[8,8], index: 9, kind: output, shape index: {}]  }
   0x1   :  { %377 = vmatprep.subr.mxu0 %v404_v0  ;;  %v33_v1 = vld [vmem:[%s498_s0 + $0x8] sm:$0xff]  ;;  %v32_v2 = vld [vmem:[%s498_s0] sm:$0xff]  ;;  %381 = vmatprep.mubr.msk.f32.mxu0 %vm405_vm0, %v404_v0  ;;  %vm123_vm2 = vcmask 64512  }
   0x2   :  { %378 = vmatpush3.msra.mxu0 %v33_v1  ;;  %v34_v3 = vld [vmem:[%s499_s1] sm:$0xff]  ;;  %402 = vset.pattern.permute.xlu0 %v406_v4 }
   0x3   :  { %v35_v5 = vld [vmem:[%s500_s2] sm:$0xff]  ;;  %379 = vmatprep.subr.mxu0 %v404_v0  ;;  %384 = vmatprep.subr.mxu1 %v404_v0 }
   0x4   :  { %38 = vperm.xlu0 %402, %v35_v5   ;;  %380 = vmatpush3.msra.mxu0 %v32_v2  ;;  %v117_v6 = vld [vmem:[%s501_s4] sm:$0xff] }
   0x5   :  { %382 = vmatmul.mubr.msk.f32.vlgmr.msra.gmra.mxu0 %vm41_vm1, %v34_v3  ;;  %386 = vmatprep.mubr.msk.f32.mxu1 %vm405_vm0, %v404_v0  ;;  %v116_v12 = vld [vmem:[%s502_s3] sm:$0xff] }
   0x6   :  { %403 = vset.pattern.permute.xlu1 %v406_v4  ;;  %394 = vmatprep.subr.mxu0 %v404_v0  ;;  %v199_v13 = vld [vmem:[%s503_s6] sm:$0xff] }
   0x7   :  { %396 = vmatprep.mubr.msk.f32.mxu0 %vm405_vm0, %v404_v0  ;;  %202 = vperm.xlu1 %403, %v199_v13   ;;  %v280_v14 = vld [vmem:[%s504_s8] sm:$0xff] }
   0x8   :  { %120 = vperm.xlu0 %402, %v117_v6   ;;  %v198_v20 = vld [vmem:[%s505_s5] sm:$0xff] }
   0x9   :  { %v279_v26 = vld [vmem:[%s506_s7] sm:$0xff] }
   0xb   :  { %283 = vperm.xlu1 %403, %v280_v14  }
  0x7f   :  { %v39_v7 = vpop.permute.xlu0 %38 }
  0x82   :  { %v203_v21 = vpop.permute.xlu1 %202 }
  0x83   :  { %v121_v15 = vpop.permute.xlu0 %120 }
  0x86   :  { %v284_v27 = vpop.permute.xlu1 %283 }
  0xc5   :  { %v111_v8 = vpop.f32.mrf.mxu0 }
  0xc6   :  { %v112_v9 = vadd.f32 %v111_v8, %v39_v7 }
  0xc7   :  { %v383_v10 = vpop.f32.mrf.mxu0 }
  0xc8   :  { %v115_v11 = vmax.f32 %v112_v9, 0.0 }
  0xca   :  { %385 = vmatpush3.msra.mxu1 %v115_v11 }
  0xcb   :  { %387 = vmatmul.mubr.msk.f32.vlgmr.msra.gmra.mxu1 %vm123_vm2, %v116_v12  ;;  %389 = vmatprep.subr.mxu1 %v404_v0 }
  0xcc   :  { %391 = vmatprep.mubr.msk.f32.mxu1 %vm405_vm0, %v404_v0 }
 0x18b   :  { %v193_v16 = vpop.f32.mrf.mxu1 }
 0x18c   :  { %v194_v17 = vadd.f32 %v193_v16, %v121_v15 }
 0x18d   :  { %v388_v18 = vpop.f32.mrf.mxu1 }
 0x18e   :  { %v197_v19 = vmax.f32 %v194_v17, 0.0 }
 0x190   :  { %390 = vmatpush3.msra.mxu1 %v197_v19 }
 0x191   :  { %392 = vmatmul.mubr.msk.f32.vlgmr.msra.gmra.mxu1 %vm123_vm2, %v198_v20 }
 0x251   :  { %v274_v22 = vpop.f32.mrf.mxu1 }
 0x252   :  { %v275_v23 = vadd.f32 %v274_v22, %v203_v21 }
 0x253   :  { %v393_v24 = vpop.f32.mrf.mxu1 }
 0x254   :  { %v278_v25 = vmax.f32 %v275_v23, 0.0 }
 0x256   :  { %395 = vmatpush3.msra.mxu0 %v278_v25 }
 0x257   :  { %397 = vmatmul.mubr.msk.f32.vlgmr.msra.gmra.mxu0 %vm123_vm2, %v279_v26 }
 0x317   :  { %v355_v28 = vpop.f32.mrf.mxu0 }
 0x318   :  { %v356_v29 = vadd.f32 %v355_v28, %v284_v27 }
 0x319   :  { %v398_v30 = vpop.f32.mrf.mxu0 }
 0x31a   :  { %359 = vst.msk [vmem:[%s507_s9] sm:$0xff] %vm123_vm2, %v356_v29 }

</bundles_post_ra>
